<compile_context>
chip_gen: v5e
topology: v5e:2x2
jax: 0.10.0
libtpu: 0.0.40
codegen_flags: <defaults>
</compile_context>

<pallas_src>
import functools

import jax
import jax.numpy as jnp
from jax.experimental import pallas as pl
from jax.experimental.pallas import tpu as pltpu

EMBEDDING_DIM = 32
EPS = 1e-5


def _round_up(a, b):
    return -(-a // b) * b


def _choose_row_tile(packed_rows, max_row_tile):
    # Tiny problems: one tile equal to the full packed-row count (always a
    # legal block shape) -- these are per-step-overhead dominated anyway.
    if packed_rows <= 64:
        return packed_rows
    # Otherwise guarantee >= 2 tiles so the "parallel" grid axis shards across
    # both v7x TensorCores; tiles are multiples of 8 sublanes and capped at
    # max_row_tile (1 MiB f32 at 2048) to stay inside v5e's scoped VMEM.
    half = _round_up(pl.cdiv(packed_rows, 2), 8)
    return min(max_row_tile, half)


def _layernorm_kernel(gamma_ref, beta_ref, avg_ref, x_ref, o_ref, *, eps):
    # x_ref:   (row_tile, W)  W = pack * d lanes; each packed row holds `pack`
    #                         logical feature rows of width d side by side.
    # avg_ref: (W, W)         block-diagonal, each d x d block filled with 1/d.
    #                         x @ avg = per-segment mean broadcast to every lane
    #                         of its own segment (MXU does reduce+broadcast).
    # gamma_ref/beta_ref: (1, W) f32, gamma/beta tiled `pack` times (resident).
    x = x_ref[...].astype(jnp.float32)
    m = avg_ref[...]
    # Both matmuls depend only on x -> they issue back-to-back on the MXU and
    # overlap with the VPU epilogue.  f32 LHS keeps mean/var within 1e-5.
    mean = jnp.dot(x, m, preferred_element_type=jnp.float32)
    ex2 = jnp.dot(x * x, m, preferred_element_type=jnp.float32)
    # Population variance (torch.var(..., unbiased=False)); clamp guards the
    # rare cancellation / garbage-row case (those writes are masked anyway).
    var = jnp.maximum(ex2 - mean * mean, 0.0)
    x_norm = (x - mean) * jax.lax.rsqrt(var + eps)
    o_ref[...] = (gamma_ref[...] * x_norm + beta_ref[...]).astype(o_ref.dtype)


def normalization_layer(x, gamma, beta, *, eps=EPS, max_row_tile=2048):
    """LayerNorm over the last axis, matching NormalizationLayer.forward."""
    orig_shape = x.shape
    d = orig_shape[-1]
    x2 = x.reshape(-1, d)
    n_rows = x2.shape[0]

    # Lane-dense packing factor: `pack` logical rows per 128-lane row.
    pack = 128 // d if (d <= 128 and 128 % d == 0) else 1
    w = pack * d

    # Pad only to a multiple of `pack` (<= pack-1 rows), and only when needed.
    pad_rows = (-n_rows) % pack
    if pad_rows:
        x2 = jnp.pad(x2, ((0, pad_rows), (0, 0)))
    packed_rows = (n_rows + pad_rows) // pack
    # Contiguous (free) reshape: each packed row = `pack` consecutive rows.
    xp = x2.reshape(packed_rows, w)

    row_tile = _choose_row_tile(packed_rows, max_row_tile)
    num_tiles = pl.cdiv(packed_rows, row_tile)  # ragged last block is masked

    gamma_t = jnp.tile(gamma.astype(jnp.float32).reshape(-1), pack).reshape(1, w)
    beta_t = jnp.tile(beta.astype(jnp.float32).reshape(-1), pack).reshape(1, w)
    # Block-diagonal averaging matrix: `pack` blocks of (d, d) filled with 1/d.
    avg = jnp.kron(
        jnp.eye(pack, dtype=jnp.float32),
        jnp.full((d, d), 1.0 / d, dtype=jnp.float32),
    )

    kernel = functools.partial(_layernorm_kernel, eps=eps)

    out = pl.pallas_call(
        kernel,
        out_shape=jax.ShapeDtypeStruct((packed_rows, w), x.dtype),
        grid_spec=pltpu.PrefetchScalarGridSpec(
            num_scalar_prefetch=0,
            grid=(num_tiles,),
            in_specs=[
                pl.BlockSpec((1, w), lambda i: (0, 0)),          # gamma (resident)
                pl.BlockSpec((1, w), lambda i: (0, 0)),          # beta  (resident)
                pl.BlockSpec((w, w), lambda i: (0, 0)),          # avg   (resident)
                pl.BlockSpec((row_tile, w), lambda i: (i, 0)),   # x tiles
            ],
            out_specs=pl.BlockSpec((row_tile, w), lambda i: (i, 0)),
        ),
        compiler_params=pltpu.CompilerParams(
            dimension_semantics=("parallel",),
        ),
    )(gamma_t, beta_t, avg, xp)

    out = out.reshape(packed_rows * pack, d)
    if pad_rows:
        out = out[:n_rows]
    return out.reshape(orig_shape)


def _reference(x, gamma, beta, eps=EPS):
    mean = jnp.mean(x, axis=-1, keepdims=True)
    var = jnp.mean((x - mean) ** 2, axis=-1, keepdims=True)
    return gamma * ((x - mean) / jnp.sqrt(var + eps)) + beta


if __name__ == "__main__":
    key = jax.random.PRNGKey(0)
    batch, seq, hidden = 2, 8, EMBEDDING_DIM  # 16 rows, hidden = 32

    k_x, k_g, k_b, k_x2, k_x3 = jax.random.split(key, 5)
    x = jax.random.normal(k_x, (batch, seq, hidden), dtype=jnp.float32)

    # Module init: nn.Parameter(torch.ones(dim)) / nn.Parameter(torch.zeros(dim))
    gamma = jnp.ones((hidden,), dtype=jnp.float32)
    beta = jnp.zeros((hidden,), dtype=jnp.float32)

    out = jax.block_until_ready(normalization_layer(x, gamma, beta))
    assert jnp.allclose(out, _reference(x, gamma, beta), atol=1e-5, rtol=1e-5), \
        "mismatch vs reference (default params)"

    # Non-trivial (deterministic) affine params.
    gamma2 = 1.0 + 0.1 * jax.random.normal(k_g, (hidden,), dtype=jnp.float32)
    beta2 = 0.1 * jax.random.normal(k_b, (hidden,), dtype=jnp.float32)
    out2 = jax.block_until_ready(normalization_layer(x, gamma2, beta2))
    assert jnp.allclose(out2, _reference(x, gamma2, beta2), atol=1e-5, rtol=1e-5), \
        "mismatch vs reference (random params)"

    # Row count not a multiple of pack=4 (exercises the tiny alignment pad).
    x_odd = jax.random.normal(k_x2, (3, 7, hidden), dtype=jnp.float32)
    out3 = jax.block_until_ready(normalization_layer(x_odd, gamma2, beta2))
    assert jnp.allclose(out3, _reference(x_odd, gamma2, beta2), atol=1e-5, rtol=1e-5), \
        "mismatch vs reference (pack-padded rows)"

    # Multi-tile grid with a ragged (masked) last block: 280 rows -> 70 packed
    # rows -> tiles of 40 + 30.
    x_big = jax.random.normal(k_x3, (4, 70, hidden), dtype=jnp.float32)
    out4 = jax.block_until_ready(normalization_layer(x_big, gamma2, beta2))
    assert jnp.allclose(out4, _reference(x_big, gamma2, beta2), atol=1e-5, rtol=1e-5), \
        "mismatch vs reference (ragged last block)"

    print("KERNEL_OK")
</pallas_src>

<mosaic_0001>
module attributes {stable_mosaic.version = 11 : i64} {
  func.func @_layernorm_kernel(%arg0: i32, %arg1: memref<1x128xf32, #tpu.memory_space<vmem>>, %arg2: memref<1x128xf32, #tpu.memory_space<vmem>>, %arg3: memref<128x128xf32, #tpu.memory_space<vmem>>, %arg4: memref<4x128xf32, #tpu.memory_space<vmem>>, %arg5: memref<4x128xf32, #tpu.memory_space<vmem>>) attributes {dimension_semantics = [#tpu.dimension_semantics<parallel>], iteration_bounds = array<i64: 1>, scalar_prefetch = 0 : i64, scratch_operands = 0 : i64, tpu.core_type = #tpu.core_type<tc>, window_params = [{pipeline_mode = #tpu.pipeline_mode<synchronous>, transform_indices = @transform_0, window_bounds = array<i64: 1, 128>}, {pipeline_mode = #tpu.pipeline_mode<synchronous>, transform_indices = @transform_1, window_bounds = array<i64: 1, 128>}, {pipeline_mode = #tpu.pipeline_mode<synchronous>, transform_indices = @transform_2, window_bounds = array<i64: 128, 128>}, {transform_indices = @transform_3, window_bounds = array<i64: 4, 128>}, {transform_indices = @transform_4, window_bounds = array<i64: 4, 128>}]} {
    %c0 = arith.constant 0 : index
    %c0_0 = arith.constant 0 : index
    %0 = vector.load %arg4[%c0, %c0_0] : memref<4x128xf32, #tpu.memory_space<vmem>>, vector<4x128xf32>
    %c0_1 = arith.constant 0 : index
    %c0_2 = arith.constant 0 : index
    %1 = vector.load %arg3[%c0_1, %c0_2] : memref<128x128xf32, #tpu.memory_space<vmem>>, vector<128x128xf32>
    %cst = arith.constant dense<0.000000e+00> : vector<4x128xf32>
    %2 = tpu.matmul %0, %1, %cst {dimension_numbers = #tpu.dot_dimension_numbers<[1], [0], [0], [1], [0, 0, 1, 1], [], []>} : vector<4x128xf32>, vector<128x128xf32>, vector<4x128xf32> -> vector<4x128xf32>
    %3 = arith.mulf %0, %0 : vector<4x128xf32>
    %cst_3 = arith.constant dense<0.000000e+00> : vector<4x128xf32>
    %4 = tpu.matmul %3, %1, %cst_3 {dimension_numbers = #tpu.dot_dimension_numbers<[1], [0], [0], [1], [0, 0, 1, 1], [], []>} : vector<4x128xf32>, vector<128x128xf32>, vector<4x128xf32> -> vector<4x128xf32>
    %5 = arith.mulf %2, %2 : vector<4x128xf32>
    %6 = arith.subf %4, %5 : vector<4x128xf32>
    %cst_4 = arith.constant 0.000000e+00 : f32
    %7 = vector.broadcast %cst_4 : f32 to vector<4x128xf32>
    %8 = arith.maximumf %6, %7 : vector<4x128xf32>
    %9 = arith.subf %0, %2 : vector<4x128xf32>
    %cst_5 = arith.constant 9.99999974E-6 : f32
    %10 = vector.broadcast %cst_5 : f32 to vector<4x128xf32>
    %11 = arith.addf %8, %10 : vector<4x128xf32>
    %12 = math.rsqrt %11 : vector<4x128xf32>
    %13 = arith.mulf %9, %12 : vector<4x128xf32>
    %c0_6 = arith.constant 0 : index
    %c0_7 = arith.constant 0 : index
    %14 = vector.load %arg1[%c0_6, %c0_7] : memref<1x128xf32, #tpu.memory_space<vmem>>, vector<1x128xf32>
    %15 = vector.broadcast %14 : vector<1x128xf32> to vector<4x128xf32>
    %16 = arith.mulf %15, %13 : vector<4x128xf32>
    %c0_8 = arith.constant 0 : index
    %c0_9 = arith.constant 0 : index
    %17 = vector.load %arg2[%c0_8, %c0_9] : memref<1x128xf32, #tpu.memory_space<vmem>>, vector<1x128xf32>
    %18 = vector.broadcast %17 : vector<1x128xf32> to vector<4x128xf32>
    %19 = arith.addf %16, %18 : vector<4x128xf32>
    %c0_10 = arith.constant 0 : index
    %c0_11 = arith.constant 0 : index
    %20 = vector.load %arg5[%c0_10, %c0_11] : memref<4x128xf32, #tpu.memory_space<vmem>>, vector<4x128xf32>
    tpu.vector_store %arg5[%c0_10, %c0_11], %19 {strides = array<i32>} : memref<4x128xf32, #tpu.memory_space<vmem>>, vector<4x128xf32>,
    return
  }
  func.func @transform_0(%arg0: i32) -> (i32, i32) {
    %c0_i32 = arith.constant 0 : i32
    %c0_i32_0 = arith.constant 0 : i32
    %c0_i32_1 = arith.constant 0 : i32
    return %c0_i32, %c0_i32_0 : i32, i32
  }
  func.func @transform_1(%arg0: i32) -> (i32, i32) {
    %c0_i32 = arith.constant 0 : i32
    %c0_i32_0 = arith.constant 0 : i32
    %c0_i32_1 = arith.constant 0 : i32
    return %c0_i32, %c0_i32_0 : i32, i32
  }
  func.func @transform_2(%arg0: i32) -> (i32, i32) {
    %c0_i32 = arith.constant 0 : i32
    %c0_i32_0 = arith.constant 0 : i32
    %c0_i32_1 = arith.constant 0 : i32
    return %c0_i32, %c0_i32_0 : i32, i32
  }
  func.func @transform_3(%arg0: i32) -> (i32, i32) {
    %c0_i32 = arith.constant 0 : i32
    %c0_i32_0 = arith.constant 0 : i32
    return %arg0, %c0_i32 : i32, i32
  }
  func.func @transform_4(%arg0: i32) -> (i32, i32) {
    %c0_i32 = arith.constant 0 : i32
    %c0_i32_0 = arith.constant 0 : i32
    return %arg0, %c0_i32 : i32, i32
  }
}

</mosaic_0001>

<bundles_post_ra>
// kernel: tpu_custom_call.1
= control target key start
LH: loop header
LB: loop body
LE: loop exit
PB: predicated region body
PF: predicated region fallthrough
CT: control target
= control target key end

     0   :  { %9 = vsyncpa [#allocation3], 0  ;;  %s365_s0 = inlined_call_operand.hbm [shape: f32[1,128], index: 0, kind: input, shape index: {}]   ;;  %s366_s1 = inlined_call_operand.hbm [shape: f32[1,128], index: 1, kind: input, shape index: {}]   ;;  %s367_s2 = inlined_call_operand.hbm [shape: f32[128,128], index: 2, kind: input, shape index: {}]   ;;  %s368_s3 = inlined_call_operand.hbm [shape: f32[4,128], index: 3, kind: input, shape index: {}]   ;;  %s369_s4 = inlined_call_operand.hbm [shape: f32[4,128], index: 4, kind: output, shape index: {}]  }
   0x1   :  { %10 = vsyncpa [#allocation6], 0 }
   0x2   :  { %11 = vsyncpa [#allocation9], 0  ;;  %s29_s17 = sshll.u32 %s366_s1, 4  ;;  %s30_s17 = int_to_ptr.hbm [resolvable:$true] %s29_s17 }
   0x3   :  { %12 = vsyncpa [#allocation4], 0  ;;  %s318_s18 = smov [#allocation5]   ;;  %s18_s22 = sshll.u32 %s365_s0, 4  ;;  %s19_s22 = int_to_ptr.hbm [resolvable:$true] %s18_s22 }
   0x4   :  { %s31_s19 = sshll.u32 %s318_s18, 4  ;;  %s319_s23 = smov [#allocation2]   ;;  %s32_s19 = int_to_ptr.vmem [resolvable:$true] %s31_s19 }
   0x5   :  { %34 = dma.hbm_to_vmem [thread:$0]  %s30_s17, 16, %s32_s19, [#allocation6]  }
   0x6   :  { %s20_s24 = sshll.u32 %s319_s23, 4  ;;  %s39_s27 = sshll.u32 %s367_s2, 4  ;;  %s21_s24 = int_to_ptr.vmem [resolvable:$true] %s20_s24  ;;  %s40_s27 = int_to_ptr.hbm [resolvable:$true] %s39_s27 }
   0x7   :  { %23 = dma.hbm_to_vmem [thread:$0]  %s19_s22, 16, %s21_s24, [#allocation3]  }
   0x8   :  { %s320_s1 = smov [#allocation7]   ;;  %s53_s5 = sshll.u32 %s368_s3, 4  ;;  %s54_s5 = int_to_ptr.hbm [resolvable:$true] %s53_s5 }
   0x9   :  { %s41_s28 = sshll.u32 %s320_s1, 4  ;;  %s321_s6 = smov 128   ;;  %s42_s28 = int_to_ptr.vmem [resolvable:$true] %s41_s28 }
   0xa   :  { %s322_s0 = smov 8   ;;  %s323_s7 = smov [#allocation8]  }
   0xb   :  { %47 = dma.hbm_to_vmem [thread:$0]  %s40_s27, 2048, %s42_s28, [#allocation6], %s321_s6, %s321_s6, %s322_s0  }
   0xc   :  { %s55_s8 = sshll.u32 %s323_s7, 4  ;;  %s56_s8 = int_to_ptr.vmem [resolvable:$true] %s55_s8 }
   0xd   :  { %58 = dma.hbm_to_vmem [thread:$0]  %s54_s5, 64, %s56_s8, [#allocation9]  }
   0xe   :  { %310 = dma.done.wait [#allocation3], 16  }
   0xf   :  { %311 = vsyncadd [#allocation3], 4294967280 }
  0x10   :  { %312 = dma.done.wait [#allocation6], 2064  }
  0x11   :  { %313 = vsyncadd [#allocation6], 4294965232 }
  0x12   :  { %314 = dma.done.wait [#allocation9], 64  }
  0x13   :  { %315 = vsyncadd [#allocation9], 4294967232  ;;  %v91_v0 = vld [vmem:[#allocation7 + $0x78] sm:$0xff]  ;;  %v90_v1 = vld [vmem:[#allocation7 + $0x70] sm:$0xff]  ;;  %s324_s2 = smov [#allocation10]   ;;  %s167_s11 = sshll.u32 %s369_s4, 4  ;;  %s168_s11 = int_to_ptr.hbm [resolvable:$true] %s167_s11 }
  0x14   :  { %92 = vmatpush.msra.mxu0 %v91_v0  ;;  %113 = vmatpush.msra.mxu1 %v91_v0  ;;  %v89_v2 = vld [vmem:[#allocation7 + $0x68] sm:$0xff]  ;;  %v88_v3 = vld [vmem:[#allocation7 + $0x60] sm:$0xff]  ;;  %v87_v4 = vld [vmem:[#allocation7 + $0x58] sm:$0xff]  ;;  %s165_s3 = sshll.u32 %s324_s2, 4  ;;  %s166_s3 = int_to_ptr.vmem [resolvable:$true] %s165_s3 }
  0x15   :  { %v86_v5 = vld [vmem:[#allocation7 + $0x50] sm:$0xff]  ;;  %v85_v6 = vld [vmem:[#allocation7 + $0x48] sm:$0xff]  ;;  %v84_v7 = vld [vmem:[#allocation7 + $0x40] sm:$0xff] }
  0x16   :  { %93 = vmatpush.msra.mxu0 %v90_v1  ;;  %114 = vmatpush.msra.mxu1 %v90_v1  ;;  %v83_v8 = vld [vmem:[#allocation7 + $0x38] sm:$0xff]  ;;  %v82_v9 = vld [vmem:[#allocation7 + $0x30] sm:$0xff]  ;;  %v81_v10 = vld [vmem:[#allocation7 + $0x28] sm:$0xff] }
  0x17   :  { %v80_v11 = vld [vmem:[#allocation7 + $0x20] sm:$0xff]  ;;  %v79_v12 = vld [vmem:[#allocation7 + $0x18] sm:$0xff]  ;;  %v78_v13 = vld [vmem:[#allocation7 + $0x10] sm:$0xff] }
  0x18   :  { %94 = vmatpush.msra.mxu0 %v89_v2  ;;  %115 = vmatpush.msra.mxu1 %v89_v2  ;;  %v75_v14 = vld [vmem:[#allocation8] sm:$0xf]  ;;  %v77_v15 = vld [vmem:[#allocation7 + $0x8] sm:$0xff]  ;;  %v186_v31 = vld [vmem:[#allocation2] ss:$0 sm:$0xff] }
  0x19   :  { %v76_v16 = vld [vmem:[#allocation7] sm:$0xff]  ;;  %v112_v17 = vmul.f32 %v75_v14, %v75_v14  ;;  %v187_v34 = vld [vmem:[#allocation5] ss:$0 sm:$0xff] }
  0x1a   :  { %95 = vmatpush.msra.mxu0 %v88_v3  ;;  %116 = vmatpush.msra.mxu1 %v88_v3 }
  0x1c   :  { %96 = vmatpush.msra.mxu0 %v87_v4  ;;  %117 = vmatpush.msra.mxu1 %v87_v4 }
  0x1e   :  { %97 = vmatpush.msra.mxu0 %v86_v5  ;;  %118 = vmatpush.msra.mxu1 %v86_v5 }
  0x20   :  { %98 = vmatpush.msra.mxu0 %v85_v6  ;;  %119 = vmatpush.msra.mxu1 %v85_v6 }
  0x22   :  { %99 = vmatpush.msra.mxu0 %v84_v7  ;;  %120 = vmatpush.msra.mxu1 %v84_v7 }
  0x24   :  { %100 = vmatpush.msra.mxu0 %v83_v8  ;;  %121 = vmatpush.msra.mxu1 %v83_v8 }
  0x26   :  { %101 = vmatpush.msra.mxu0 %v82_v9  ;;  %122 = vmatpush.msra.mxu1 %v82_v9 }
  0x28   :  { %102 = vmatpush.msra.mxu0 %v81_v10  ;;  %123 = vmatpush.msra.mxu1 %v81_v10 }
  0x2a   :  { %103 = vmatpush.msra.mxu0 %v80_v11  ;;  %124 = vmatpush.msra.mxu1 %v80_v11 }
  0x2c   :  { %104 = vmatpush.msra.mxu0 %v79_v12  ;;  %125 = vmatpush.msra.mxu1 %v79_v12 }
  0x2e   :  { %105 = vmatpush.msra.mxu0 %v78_v13  ;;  %126 = vmatpush.msra.mxu1 %v78_v13 }
  0x30   :  { %106 = vmatpush.msra.mxu0 %v77_v15  ;;  %127 = vmatpush.msra.mxu1 %v77_v15 }
  0x32   :  { %107 = vmatpush.msra.mxu0 %v76_v16  ;;  %128 = vmatpush.msra.mxu1 %v76_v16 }
  0x33   :  { %108 = vmatmul.f32.vlgmr.msra.gmra.mxu0 %v75_v14  ;;  %129 = vmatmul.f32.vlgmr.msra.gmra.mxu1 %v112_v17 }
  0xb0   :  { %v109_v18 = vpop.f32.mrf.mxu0  ;;  %v130_v19 = vpop.f32.mrf.mxu1 }
  0xb1   :  { %v133_v20 = vmul.f32 %v109_v18, %v109_v18  ;;  %v136_v30 = vsub.f32 %v75_v14, %v109_v18 }
  0xb3   :  { %v134_v21 = vsub.f32 %v130_v19, %v133_v20 }
  0xb5   :  { %v135_v22 = vmax.f32 %v134_v21, 0.0 }
  0xb7   :  { %v137_v23 = vadd.f32 1e-05, %v135_v22 }
  0xb9   :  { %188 = vrsqrt.f32 %v137_v23  ;;  %vm144_vm1 = vweird.f32 %v137_v23 }
  0xbf   :  { %v189_v24 = vpop.eup %188 }
  0xc0   :  { %v139_v25 = vmul.f32 %v189_v24, %v137_v23  ;;  %vm145_vm0 = vweird.f32 %v189_v24 }
  0xc1   :  { %vm146_vm2 = vmor %vm144_vm1, %vm145_vm0 }
  0xc2   :  { %v140_v26 = vmul.f32 %v189_v24, %v139_v25 }
  0xc4   :  { %v141_v27 = vmul.f32 0.5, %v140_v26 }
  0xc6   :  { %v142_v28 = vsub.f32 1.5, %v141_v27 }
  0xc8   :  { %v143_v29 = vmul.f32 %v189_v24, %v142_v28 }
  0xca   :  { %v147_v32 = vsel %vm146_vm2, %v189_v24, %v143_v29 }
  0xcb   :  { %v148_v33 = vmul.f32 %v147_v32, %v136_v30 }
  0xcd   :  { %v153_v35 = vmul.f32 %v186_v31, %v148_v33 }
  0xcf   :  { %v158_v36 = vadd.f32 %v187_v34, %v153_v35 }
  0xd1   :  { %159 = vst [vmem:[#allocation10] sm:$0xf] %v158_v36 }
  0xd2   :  { %170 = dma.vmem_to_hbm [thread:$0]  %s166_s3, 64, %s168_s11, [#allocation4]  }
  0xd3   :  { %316 = dma.done.wait [#allocation4], 64  }
  0xd4   :  { %317 = vsyncadd [#allocation4], 4294967232 }
  0xd5   :  { %175 = vsyncpa [#allocation3], 1 }
  0xd6   :  { %176 = vsyncpa [#allocation6], 1 }
  0xd7   :  { %177 = vsyncpa [#allocation9], 1 }
  0xd8   :  { %178 = vsyncpa [#allocation4], 1 }

</bundles_post_ra>
